<compile_context>
chip_gen: v7x
topology: tpu7x:2x2x1
jax: 0.10.0
libtpu: 0.0.40
codegen_flags: <defaults>
</compile_context>

<pallas_src>
import jax
import jax.numpy as jnp
from jax.experimental import pallas as pl
from jax.experimental.pallas import tpu as pltpu

N, C_IN, H, W = 2, 1, 4, 4
C_OUT = 3
KH = KW = 3
HO, WO = H - KH + 1, W - KW + 1      # 2, 2
P = HO * WO                          # 4 conv-output positions == one 2x2 pool window
K = C_IN * KH * KW                   # 9 taps
D_OUT = 2


def _make_kernel(n):
    """Kernel with the (static) batch size baked into the row-group slices."""

    def kernel(p_ref, w_ref, o_ref):
        # p_ref : (P*n, K)          im2col patches, rows [p*n:(p+1)*n] = position p
        # w_ref : (K+D_OUT, C_OUT)  rows 0..K-1: conv taps, rows K..: dense weight (torch layout)
        # o_ref : (n, D_OUT)
        wc = w_ref[:K, :]                                    # (K, C_OUT)
        wd_t = w_ref[K:, :]                                  # (D_OUT, C_OUT)

        # Conv-as-matmul: single MXU push for all positions and all batch rows.
        conv = jnp.dot(p_ref[...], wc,
                       preferred_element_type=jnp.float32)   # (P*n, C_OUT)
        act = jnp.maximum(conv, 0.0)                         # ReLU (VPU)

        # MaxPool2d(2,2): max over the P=4 row-groups, 2-level tree (not a serial chain).
        pooled = jnp.maximum(
            jnp.maximum(act[0 * n:1 * n], act[1 * n:2 * n]),
            jnp.maximum(act[2 * n:3 * n], act[3 * n:4 * n]))  # (n, C_OUT)

        # Linear(3,2) on the VPU: out[:, d] = sum_c pooled[:, c] * wd_t[d, c]
        cols = [jnp.sum(pooled * wd_t[d:d + 1, :], axis=-1, keepdims=True)
                for d in range(D_OUT)]                        # D_OUT x (n, 1)
        o_ref[...] = jnp.concatenate(cols, axis=-1).astype(o_ref.dtype)

    return kernel


def mininet_forward(x, w_conv, w_dense):
    # x: (n, 1, 4, 4) f32, w_conv: (C_OUT, 1, 3, 3) [torch OIHW], w_dense: (D_OUT, C_OUT)
    n, c_in, h, w = x.shape
    # Linear(3, 2) forces pooled features == 3, i.e. conv output 2x2 -> pool 1x1 -> 4x4 input.
    assert (c_in, h, w) == (C_IN, H, W), f"MiniNet requires (1,4,4) input, got {(c_in, h, w)}"
    assert (HO, WO) == (2, 2) and P == 4

    xs = x[:, 0].astype(jnp.float32)                          # (n, H, W)
    # im2col (wrapper glue): position-major rows, tap order (i, j) matching OIHW weight reshape.
    patches = [xs[:, oh:oh + KH, ow:ow + KW].reshape(n, K)
               for oh in range(HO) for ow in range(WO)]
    p = jnp.concatenate(patches, axis=0)                      # (P*n, K)

    # Pack both weights into one VMEM input: rows 0..K-1 conv taps, rows K.. dense weight.
    wc = w_conv.reshape(C_OUT, K).T.astype(jnp.float32)       # (K, C_OUT)
    w_packed = jnp.concatenate(
        [wc, w_dense.astype(jnp.float32)], axis=0)            # (K + D_OUT, C_OUT)

    vmem = pl.BlockSpec(memory_space=pltpu.MemorySpace.VMEM)  # tiny arrays: whole-array in VMEM
    return pl.pallas_call(
        _make_kernel(n),
        out_shape=jax.ShapeDtypeStruct((n, D_OUT), jnp.float32),
        in_specs=[vmem, vmem],
        out_specs=vmem,
    )(p, w_packed)


def mininet_reference(x, w_conv, w_dense):
    # pure-JAX reference reproducing the torch forward
    conv = jax.lax.conv_general_dilated(
        x.astype(jnp.float32), w_conv.astype(jnp.float32),
        window_strides=(1, 1), padding="VALID",
        dimension_numbers=("NCHW", "OIHW", "NCHW"))
    act = jnp.maximum(conv, 0.0)
    pooled = jax.lax.reduce_window(
        act, -jnp.inf, jax.lax.max,
        window_dimensions=(1, 1, 2, 2), window_strides=(1, 1, 2, 2),
        padding="VALID")
    flat = pooled.reshape(x.shape[0], -1)
    return flat @ w_dense.T


if __name__ == "__main__":
    key = jax.random.PRNGKey(0)
    kx, kc, kd = jax.random.split(key, 3)
    # deterministic synthetic parameters (shapes from MiniNet.__init__)
    x = jax.random.normal(kx, (N, C_IN, H, W), dtype=jnp.float32)
    w_conv = jax.random.normal(kc, (C_OUT, C_IN, KH, KW), dtype=jnp.float32) * 0.3
    w_dense = jax.random.normal(kd, (D_OUT, C_OUT), dtype=jnp.float32) * 0.3

    out = jax.block_until_ready(mininet_forward(x, w_conv, w_dense))

    ref = mininet_reference(x, w_conv, w_dense)
    assert out.shape == (N, D_OUT)
    assert jnp.allclose(out, ref, atol=1e-5, rtol=1e-5)
    print("KERNEL_OK")
</pallas_src>

<mosaic_0001>
module attributes {stable_mosaic.version = 11 : i64} {
  func.func @kernel(%arg0: memref<8x9xf32, #tpu.memory_space<vmem>>, %arg1: memref<11x3xf32, #tpu.memory_space<vmem>>, %arg2: memref<2x2xf32, #tpu.memory_space<vmem>>) attributes {dimension_semantics = [], scalar_prefetch = 0 : i64, scratch_operands = 0 : i64, tpu.core_type = #tpu.core_type<tc>} {
    %c0 = arith.constant 0 : index
    %c0_0 = arith.constant 0 : index
    %0 = vector.load %arg1[%c0, %c0_0] : memref<11x3xf32, #tpu.memory_space<vmem>>, vector<9x3xf32>
    %c9 = arith.constant 9 : index
    %c0_1 = arith.constant 0 : index
    %1 = vector.load %arg1[%c9, %c0_1] : memref<11x3xf32, #tpu.memory_space<vmem>>, vector<2x3xf32>
    %c0_2 = arith.constant 0 : index
    %c0_3 = arith.constant 0 : index
    %2 = vector.load %arg0[%c0_2, %c0_3] : memref<8x9xf32, #tpu.memory_space<vmem>>, vector<8x9xf32>
    %cst = arith.constant dense<0.000000e+00> : vector<8x3xf32>
    %3 = tpu.matmul %2, %0, %cst {dimension_numbers = #tpu.dot_dimension_numbers<[1], [0], [0], [1], [0, 0, 1, 1], [], []>} : vector<8x9xf32>, vector<9x3xf32>, vector<8x3xf32> -> vector<8x3xf32>
    %cst_4 = arith.constant 0.000000e+00 : f32
    %4 = vector.broadcast %cst_4 : f32 to vector<8x3xf32>
    %5 = arith.maximumf %3, %4 : vector<8x3xf32>
    %6 = vector.extract_strided_slice %5 {offsets = [0, 0], sizes = [2, 3], strides = [1, 1]} : vector<8x3xf32> to vector<2x3xf32>
    %7 = vector.extract_strided_slice %5 {offsets = [2, 0], sizes = [2, 3], strides = [1, 1]} : vector<8x3xf32> to vector<2x3xf32>
    %8 = arith.maximumf %6, %7 : vector<2x3xf32>
    %9 = vector.extract_strided_slice %5 {offsets = [4, 0], sizes = [2, 3], strides = [1, 1]} : vector<8x3xf32> to vector<2x3xf32>
    %10 = vector.extract_strided_slice %5 {offsets = [6, 0], sizes = [2, 3], strides = [1, 1]} : vector<8x3xf32> to vector<2x3xf32>
    %11 = arith.maximumf %9, %10 : vector<2x3xf32>
    %12 = arith.maximumf %8, %11 : vector<2x3xf32>
    %13 = vector.extract_strided_slice %1 {offsets = [0, 0], sizes = [1, 3], strides = [1, 1]} : vector<2x3xf32> to vector<1x3xf32>
    %14 = vector.broadcast %13 : vector<1x3xf32> to vector<2x3xf32>
    %15 = arith.mulf %12, %14 : vector<2x3xf32>
    %cst_5 = arith.constant dense<0.000000e+00> : vector<2xf32>
    %16 = vector.multi_reduction <add>, %15, %cst_5 [1] : vector<2x3xf32> to vector<2xf32>
    %17 = vector.shape_cast %16 : vector<2xf32> to vector<2x1xf32>
    %18 = vector.extract_strided_slice %1 {offsets = [1, 0], sizes = [1, 3], strides = [1, 1]} : vector<2x3xf32> to vector<1x3xf32>
    %19 = vector.broadcast %18 : vector<1x3xf32> to vector<2x3xf32>
    %20 = arith.mulf %12, %19 : vector<2x3xf32>
    %cst_6 = arith.constant dense<0.000000e+00> : vector<2xf32>
    %21 = vector.multi_reduction <add>, %20, %cst_6 [1] : vector<2x3xf32> to vector<2xf32>
    %22 = vector.shape_cast %21 : vector<2xf32> to vector<2x1xf32>
    %23 = tpu.concatenate %17, %22 in 1 : vector<2x1xf32>, vector<2x1xf32> -> vector<2x2xf32>
    %c0_7 = arith.constant 0 : index
    %c0_8 = arith.constant 0 : index
    %24 = vector.load %arg2[%c0_7, %c0_8] : memref<2x2xf32, #tpu.memory_space<vmem>>, vector<2x2xf32>
    tpu.vector_store %arg2[%c0_7, %c0_8], %23 {strides = array<i32>} : memref<2x2xf32, #tpu.memory_space<vmem>>, vector<2x2xf32>,
    return
  }
}

</mosaic_0001>

<bundles_post_ra>
// kernel: tpu_custom_call.1
= control target key start
LH: loop header
LB: loop body
LE: loop exit
PB: predicated region body
PF: predicated region fallthrough
CT: control target
= control target key end

     0   :  { %vm20_vm0 = vcmask 1040384   ;;  %v183_v2 = vmov 0.0|0.0   ;;  %vm184_vm1 = vmmov 1   ;;  %vm185_vm3 = vmmov 0   ;;  %s227_s0 = inlined_call_operand.vmem [shape: f32[8,9], index: 0, kind: input, shape index: {}]   ;;  %s228_s1 = inlined_call_operand.vmem [shape: f32[11,3], index: 1, kind: input, shape index: {}]   ;;  %s229_s2 = inlined_call_operand.hbm [shape: f32[2,2], index: 2, kind: output, shape index: {}]  }
   0x1   :  { %v12_v0 = vld [vmem:[%s228_s1] sm:$0xff]  ;;  %v13_v1 = vld [vmem:[%s228_s1 + $0x8] sm:$0x1]  ;;  %150 = vmatprep.subr.bf16.mxu0 %v183_v2  ;;  %vm152_vm2 = vmpackc.low %vm20_vm0, %vm184_vm1  ;;  %v186_v4 = vmov 0.0  }
   0x2   :  { %v151_v3 = vpack.c.bf16 %v13_v1, %v12_v0  ;;  %147 = vmatprep.mubr.msk.f32.mxu0 %vm185_vm3, %v186_v4 }
   0x3   :  { %7 = vsyncpa [#allocation3], 0  ;;  %v15_v5 = vld [vmem:[%s227_s0] sm:$0xff]  ;;  %vm16_vm4 = vcmask 72704   ;;  %v103_v6 = vlaneseq  ;;  %v14_v13 = vld [vmem:[%s228_s1 + $0x9] sm:$0x3] }
   0x4   :  { %153 = vmatpush3.bf16.msk.msra.mxu0 %vm152_vm2, %v151_v3  ;;  %vm108_vm5 = vcmask 17408   ;;  %s187_s0 = smov [#allocation2]   ;;  %vm120_vm6 = vcmask 7168   ;;  %vm122_vm7 = vcmask 9216  }
   0x5   :  { %v104_v7 = vshrl.u32 %v103_v6, 7  ;;  %s130_s17 = sshll.u32 %s187_s0, 4  ;;  %s131_s17 = int_to_ptr.vmem [resolvable:$true] %s130_s17 }
   0x6   :  { %s159_s1 = scalar_lea.vmem %s131_s17, 32  ;;  %p164_p1 = scmp.lt.s32.totalorder %s131_s17, %s131_s17 }
   0x7   :  { %148 = vmatmul.mubr.msk.f32.vlgmr.msra.gmra.mrb[0].mxu0 %vm16_vm4, %v15_v5  ;;  %v105_v12 = vsub.s32 0, %v104_v7  ;;  %v114_v15 = vsub.s32 1, %v104_v7  ;;  %p160_p0 = scmp.ne.s32.totalorder %s131_s17, %s159_s1  ;;  %p165_p2 = scmp.lt.s32.totalorder %s159_s1, %s159_s1 }
   0x9   :  { %v106_v17 = vrot.slane %v14_v13, %v105_v12  ;;  %v115_v19 = vrot.slane %v14_v13, %v114_v15  ;;  %p166_p3 = por %p165_p2, %p164_p1 }
   0xb   :  { %p167_p4 = pnand %p166_p3, %p160_p0 }
  0xda   :  { %v90_v8 = vpop.f32.mrb[0].mxu0 }
  0xdb   :  { %v94_v9 = vmax.f32 %v90_v8, 0.0  ;;  %v149_v10 = vpop.f32.mrb[1].mxu0 }
  0xdd   :  { %v96_v11 = vrot.slane %v94_v9, 2 }
  0xdf   :  { %v98_v14 = vmax.f32 %v94_v9, %v96_v11 }
  0xe1   :  { %v100_v16 = vrot.slane %v98_v14, 4 }
  0xe3   :  { %v102_v18 = vmax.f32 %v98_v14, %v100_v16 }
  0xe5   :  { %v107_v20 = vmul.f32 %v106_v17, %v102_v18  ;;  %v116_v22 = vmul.f32 %v115_v19, %v102_v18 }
  0xe7   :  { %v109_v21 = vsel %vm108_vm5, %v107_v20, 0.0  ;;  %v117_v23 = vsel %vm108_vm5, %v116_v22, 0.0 }
  0xe8   :  { %110 = vadd.xlane.f32.xlu0 %v109_v21 }
  0xec   :  { %118 = vadd.xlane.f32.xlu0 %v117_v23 }
 0x175   :  { %v111_v24 = vpop.xlane.xlu0 %110 }
 0x179   :  { %v119_v25 = vpop.xlane.xlu0 %118 }
 0x17a   :  { %v121_v26 = vsel %vm120_vm6, %v111_v24, %v119_v25 }
 0x17b   :  { %123 = vst.msk [vmem:[#allocation2] sm:$0x3] %vm122_vm7, %v121_v26 }
 0x17c   :  { %170 = shalt.err (!%p167_p4)
}
 0x17d   :  { %s171_s20 = scalar_lea.hbm %s229_s2, 32 }
 0x17e   :  { %p172_p5 = scmp.ne.s32.totalorder %s229_s2, %s171_s20  ;;  %p175_p6 = scmp.lt.u32.totalorder %s171_s20, %s229_s2 }
 0x180   :  { %p177_p7 = pnand %p175_p6, %p172_p5 }
 0x182   :  { %180 = shalt.err (!%p177_p7)
}
 0x183   :  { %133 = dma.vmem_to_hbm [thread:$0]  %s131_s17, 32, %s229_s2, [#allocation3]  }
 0x184   :  { %181 = dma.done.wait [#allocation3], 32  }
 0x185   :  { %182 = vsyncadd [#allocation3], 4294967264 }
 0x186   :  { %137 = vsyncpa [#allocation3], 1 }

</bundles_post_ra>
